<compile_context>
chip_gen: v5e
topology: v5e:2x2
jax: 0.10.0
libtpu: 0.0.40
codegen_flags: <defaults>
</compile_context>

<pallas_src>
import functools

import jax
import jax.numpy as jnp
from jax import lax
from jax.experimental import pallas as pl
from jax.experimental.pallas import tpu as pltpu

BN_EPS = 1e-5
_LANE = 128


# ---------------------------------------------------------------------------
# Hardware introspection (generation-aware budgets), cached.
# ---------------------------------------------------------------------------
@functools.lru_cache(maxsize=1)
def _vmem_capacity_bytes():
    try:
        return int(pltpu.get_tpu_info().vmem_capacity_bytes)
    except Exception:
        return 64 << 20  # conservative (v7x-sized) fallback


@functools.lru_cache(maxsize=1)
def _is_multi_tensorcore_chip():
    # v7x: 2 TensorCores per chip and only 64 MiB VMEM per core.
    try:
        kind = jax.devices()[0].device_kind.lower()
    except Exception:
        kind = ""
    return ("v7" in kind) or (_vmem_capacity_bytes() <= (64 << 20))


# ---------------------------------------------------------------------------
# Kernel
# ---------------------------------------------------------------------------
def dense_block_kernel(x_ref, w_ref, gb_ref, o_ref, acc_ref):
    k = pl.program_id(1)

    @pl.when(k == 0)
    def _():
        acc_ref[...] = jnp.zeros_like(acc_ref)

    # Linear (bias intentionally omitted: it cancels in training-mode BN).
    # MXU matmul with f32 accumulation regardless of operand dtype.
    acc_ref[...] += jnp.dot(x_ref[...], w_ref[...],
                            preferred_element_type=jnp.float32)

    @pl.when(k == pl.num_programs(1) - 1)
    def _():
        # BatchNorm1d, training mode (biased batch statistics), all in f32.
        y = acc_ref[...]
        inv_b = 1.0 / y.shape[0]
        mean = jnp.sum(y, axis=0, keepdims=True) * inv_b            # (1, tn)
        centered = y - mean                                          # (B, tn)
        var = jnp.sum(centered * centered, axis=0, keepdims=True) * inv_b
        # Fold affine: one narrow rsqrt (EUP) + one full-width FMA + ReLU.
        scale = gb_ref[0:1, :] * lax.rsqrt(var + BN_EPS)             # (1, tn)
        beta = gb_ref[1:2, :]                                        # (1, tn)
        o_ref[...] = jnp.maximum(centered * scale + beta, 0.0).astype(o_ref.dtype)


# ---------------------------------------------------------------------------
# Tiling / VMEM budgeting
# ---------------------------------------------------------------------------
def _pick_tile_k(k_in):
    if k_in <= 512:
        return k_in
    for c in (512, 384, 256, 128):
        if k_in % c == 0:
            return c
    return k_in  # non-divisible K: keep whole (full-dim block is always legal)


def _tile_vmem_bytes(batch, tile_k, tile_n, elt_mm, elt_out):
    # Double-buffered x / W / [gamma;beta] / out blocks + f32 accumulator
    # scratch + slack for compiler-internal scratch.
    return (2 * batch * tile_k * elt_mm          # x (double-buffered by default)
            + 2 * tile_k * tile_n * elt_mm       # W tile
            + 2 * 2 * tile_n * 4                 # [gamma; beta]
            + 2 * batch * tile_n * elt_out       # out tile
            + batch * tile_n * 4                 # f32 accumulator
            + (4 << 20))


def _pick_tile_n(n_pad, *, batch, tile_k, elt_mm, elt_out, usable_vmem,
                 prefer_split):
    # Largest lane-dense tile that fits the VMEM budget; on 2-TC chips prefer a
    # tile leaving >= 2 grid steps so the "parallel" N axis spans both cores.
    max_tile = 512 if prefer_split else 1024
    cands = [c for c in (1024, 512, 384, 256, 128)
             if c <= max_tile and n_pad % c == 0
             and _tile_vmem_bytes(batch, tile_k, c, elt_mm, elt_out) <= usable_vmem]
    if not cands:
        return 128 if n_pad % 128 == 0 else n_pad
    if prefer_split:
        for c in cands:
            if n_pad // c >= 2:
                return c
    return cands[0]


# ---------------------------------------------------------------------------
# One-time parameter preparation (outside the per-call hot path)
# ---------------------------------------------------------------------------
def prepare_params(w, b=None, gamma=None, beta=None, *, use_bf16_matmul=True):
    """Cast/pack DenseBlock parameters once.

    Returns (w_mm, gb, n_out):
      w_mm : (C_in, N_pad) weight in the matmul dtype (bf16 fast path default),
             N padded up to a multiple of 128 for lane-dense tiles/stores.
      gb   : (2, N_pad) f32 [gamma; beta] side input (single DMA per step).
      n_out: the original, unpadded output width.

    `b` is accepted for API parity but dropped: a pre-BN bias cancels exactly
    in the training-mode batch-mean subtraction. (NOT valid for norm=None /
    instance norm / eval-mode BN.)
    """
    del b
    k_in, n_out = w.shape
    if gamma is None:
        gamma = jnp.ones((n_out,), jnp.float32)
    if beta is None:
        beta = jnp.zeros((n_out,), jnp.float32)
    gamma = gamma.astype(jnp.float32)
    beta = beta.astype(jnp.float32)
    w = w.astype(jnp.float32)

    n_pad = ((n_out + _LANE - 1) // _LANE) * _LANE
    if n_pad != n_out:
        pad = n_pad - n_out
        w = jnp.pad(w, ((0, 0), (0, pad)))
        gamma = jnp.pad(gamma, (0, pad), constant_values=1.0)
        beta = jnp.pad(beta, (0, pad))

    gb = jnp.stack([gamma, beta], axis=0)                      # (2, N_pad)
    w_mm = w.astype(jnp.bfloat16) if use_bf16_matmul else w    # persistent cast
    return w_mm, gb, n_out


# ---------------------------------------------------------------------------
# pallas_call wrapper
# ---------------------------------------------------------------------------
@functools.partial(
    jax.jit,
    static_argnames=("tile_n", "tile_k", "n_out", "vmem_limit", "mm_dtype"))
def _dense_block_call(x, w_mm, gb, *, tile_n, tile_k, n_out, vmem_limit, mm_dtype):
    batch, k_in = x.shape
    k_in2, n_pad = w_mm.shape
    assert k_in == k_in2
    assert n_pad % tile_n == 0 and k_in % tile_k == 0

    mm_dtype = jnp.dtype(mm_dtype)
    x_mm = x.astype(mm_dtype)  # per-call activation cast only (B*K bytes)

    elt_mm = mm_dtype.itemsize
    elt_out = jnp.dtype(x.dtype).itemsize
    cost = pl.CostEstimate(
        flops=2 * batch * k_in * n_pad,
        transcendentals=n_pad,                        # one rsqrt per feature
        bytes_accessed=(batch * k_in * elt_mm         # x read once
                        + k_in * n_pad * elt_mm       # W read once
                        + batch * n_pad * elt_out     # out written once
                        + 2 * n_pad * 4))             # gamma/beta

    out = pl.pallas_call(
        dense_block_kernel,
        out_shape=jax.ShapeDtypeStruct((batch, n_pad), x.dtype),
        grid_spec=pltpu.PrefetchScalarGridSpec(
            num_scalar_prefetch=0,
            grid=(n_pad // tile_n, k_in // tile_k),
            in_specs=[
                pl.BlockSpec((batch, tile_k), lambda j, k: (0, k)),    # x
                pl.BlockSpec((tile_k, tile_n), lambda j, k: (k, j)),   # W tile
                pl.BlockSpec((2, tile_n), lambda j, k: (0, j)),        # [gamma; beta]
            ],
            out_specs=pl.BlockSpec((batch, tile_n), lambda j, k: (0, j)),
            scratch_shapes=[pltpu.VMEM((batch, tile_n), jnp.float32)],
        ),
        compiler_params=pltpu.CompilerParams(
            dimension_semantics=("parallel", "arbitrary"),
            vmem_limit_bytes=vmem_limit,
        ),
        cost_estimate=cost,
    )(x_mm, w_mm, gb)

    if n_out != n_pad:
        out = out[:, :n_out]
    return out


def dense_block(x, w_mm, gb, *, n_out=None, tile_n=None, tile_k=None):
    """Fused Linear -> BatchNorm1d(train) -> ReLU.

    `w_mm` / `gb` come from `prepare_params` (pre-cast, pre-padded, pre-stacked
    once, outside the hot path).
    """
    batch, k_in = x.shape
    k_in2, n_pad = w_mm.shape
    if k_in != k_in2:
        raise ValueError(f"x has K={k_in} but weight has K={k_in2}")
    if batch < 2:
        # PyTorch BatchNorm1d also rejects batch=1 in training mode (var = 0).
        raise ValueError("training-mode BatchNorm1d needs batch size >= 2")
    if n_out is None:
        n_out = n_pad

    usable_vmem = max(_vmem_capacity_bytes() - (16 << 20), 16 << 20)
    elt_mm = jnp.dtype(w_mm.dtype).itemsize
    elt_out = jnp.dtype(x.dtype).itemsize
    if tile_k is None:
        tile_k = _pick_tile_k(k_in)
    if tile_n is None:
        tile_n = _pick_tile_n(n_pad, batch=batch, tile_k=tile_k, elt_mm=elt_mm,
                              elt_out=elt_out, usable_vmem=usable_vmem,
                              prefer_split=_is_multi_tensorcore_chip())

    vmem_est = _tile_vmem_bytes(batch, tile_k, tile_n, elt_mm, elt_out)
    vmem_limit = int(min(max(vmem_est, 16 << 20), usable_vmem))

    return _dense_block_call(x, w_mm, gb, tile_n=int(tile_n), tile_k=int(tile_k),
                             n_out=int(n_out), vmem_limit=vmem_limit,
                             mm_dtype=str(w_mm.dtype))


# ---------------------------------------------------------------------------
# Pure-JAX reference (full PyTorch-equivalent forward, bias included)
# ---------------------------------------------------------------------------
def reference(x, w, b, gamma, beta):
    y = x @ w + b
    mean = jnp.mean(y, axis=0, keepdims=True)
    var = jnp.mean((y - mean) ** 2, axis=0, keepdims=True)
    y = gamma * (y - mean) / jnp.sqrt(var + BN_EPS) + beta
    return jnp.maximum(y, 0.0)


if __name__ == "__main__":
    # DenseBlock(input_size=32, output_size=128, bias=True,
    #            activation='relu', norm='batch')
    B, IN, OUT = 8, 32, 128

    key = jax.random.PRNGKey(0)
    kx, kw, kb, kx2, kw2, kb2 = jax.random.split(key, 6)

    x = jax.random.normal(kx, (B, IN), dtype=jnp.float32)
    bound = 1.0 / (IN ** 0.5)
    w = jax.random.uniform(kw, (IN, OUT), jnp.float32, -bound, bound)
    b = jax.random.uniform(kb, (OUT,), jnp.float32, -bound, bound)
    gamma = jnp.ones((OUT,), jnp.float32)
    beta = jnp.zeros((OUT,), jnp.float32)

    ref = reference(x, w, b, gamma, beta)

    # f32 path (tight numerical check against the PyTorch-equivalent forward).
    w32, gb32, n32 = prepare_params(w, b, gamma, beta, use_bf16_matmul=False)
    out32 = jax.block_until_ready(dense_block(x, w32, gb32, n_out=n32))
    assert out32.shape == (B, OUT)
    assert jnp.allclose(out32, ref, atol=1e-4, rtol=1e-4), (
        float(jnp.max(jnp.abs(out32 - ref))))

    # bf16 fast path (default): W streamed at half the bytes, f32 accumulate
    # and f32 BN/ReLU epilogue. Looser tolerance vs the f32 reference.
    wbf, gbbf, nbf = prepare_params(w, b, gamma, beta, use_bf16_matmul=True)
    outbf = jax.block_until_ready(dense_block(x, wbf, gbbf, n_out=nbf))
    assert outbf.shape == (B, OUT)
    assert jnp.allclose(outbf, ref, atol=3e-2, rtol=3e-2), (
        float(jnp.max(jnp.abs(outbf - ref))))

    # Awkward width: N=96 exercises the pad-to-128 + output-slice path.
    B2, IN2, OUT2 = 4, 48, 96
    bound2 = 1.0 / (IN2 ** 0.5)
    x2 = jax.random.normal(kx2, (B2, IN2), jnp.float32)
    w2 = jax.random.uniform(kw2, (IN2, OUT2), jnp.float32, -bound2, bound2)
    b2 = jax.random.uniform(kb2, (OUT2,), jnp.float32, -bound2, bound2)
    g2 = jnp.ones((OUT2,), jnp.float32)
    be2 = jnp.zeros((OUT2,), jnp.float32)
    w2p, gb2, n2 = prepare_params(w2, b2, g2, be2, use_bf16_matmul=False)
    out2 = jax.block_until_ready(dense_block(x2, w2p, gb2, n_out=n2))
    ref2 = reference(x2, w2, b2, g2, be2)
    assert out2.shape == (B2, OUT2)
    assert jnp.allclose(out2, ref2, atol=1e-4, rtol=1e-4), (
        float(jnp.max(jnp.abs(out2 - ref2))))

    print("KERNEL_OK")
</pallas_src>

<mosaic_0001>
module attributes {stable_mosaic.version = 11 : i64} {
  func.func @dense_block_kernel(%arg0: i32, %arg1: i32, %arg2: memref<8x32xf32, #tpu.memory_space<vmem>>, %arg3: memref<32x128xf32, #tpu.memory_space<vmem>>, %arg4: memref<2x128xf32, #tpu.memory_space<vmem>>, %arg5: memref<8x128xf32, #tpu.memory_space<vmem>>, %arg6: memref<8x128xf32, #tpu.memory_space<vmem>>) attributes {dimension_semantics = [#tpu.dimension_semantics<parallel>, #tpu.dimension_semantics<arbitrary>], iteration_bounds = array<i64: 1, 1>, scalar_prefetch = 0 : i64, scratch_operands = 1 : i64, tpu.core_type = #tpu.core_type<tc>, window_params = [{transform_indices = @transform_0, window_bounds = array<i64: 8, 32>}, {transform_indices = @transform_1, window_bounds = array<i64: 32, 128>}, {transform_indices = @transform_2, window_bounds = array<i64: 2, 128>}, {transform_indices = @transform_3, window_bounds = array<i64: 8, 128>}]} {
    %c0_i32 = arith.constant 0 : i32
    %0 = arith.cmpi eq, %arg1, %c0_i32 : i32
    %1 = arith.extui %0 : i1 to i32
    %c0_i32_0 = arith.constant 0 : i32
    %2 = arith.cmpi ne, %1, %c0_i32_0 : i32
    scf.if %2 {
      %cst_10 = arith.constant 0.000000e+00 : f32
      %12 = vector.broadcast %cst_10 : f32 to vector<8x128xf32>
      %c0_11 = arith.constant 0 : index
      %c0_12 = arith.constant 0 : index
      %13 = vector.load %arg6[%c0_11, %c0_12] : memref<8x128xf32, #tpu.memory_space<vmem>>, vector<8x128xf32>
      tpu.vector_store %arg6[%c0_11, %c0_12], %12 {strides = array<i32>} : memref<8x128xf32, #tpu.memory_space<vmem>>, vector<8x128xf32>,
    } else {
    }
    %c0 = arith.constant 0 : index
    %c0_1 = arith.constant 0 : index
    %3 = vector.load %arg6[%c0, %c0_1] : memref<8x128xf32, #tpu.memory_space<vmem>>, vector<8x128xf32>
    %c0_2 = arith.constant 0 : index
    %c0_3 = arith.constant 0 : index
    %4 = vector.load %arg2[%c0_2, %c0_3] : memref<8x32xf32, #tpu.memory_space<vmem>>, vector<8x32xf32>
    %c0_4 = arith.constant 0 : index
    %c0_5 = arith.constant 0 : index
    %5 = vector.load %arg3[%c0_4, %c0_5] : memref<32x128xf32, #tpu.memory_space<vmem>>, vector<32x128xf32>
    %cst = arith.constant dense<0.000000e+00> : vector<8x128xf32>
    %6 = tpu.matmul %4, %5, %cst {dimension_numbers = #tpu.dot_dimension_numbers<[1], [0], [0], [1], [0, 0, 1, 1], [], []>} : vector<8x32xf32>, vector<32x128xf32>, vector<8x128xf32> -> vector<8x128xf32>
    %7 = arith.addf %3, %6 : vector<8x128xf32>
    %c0_6 = arith.constant 0 : index
    %c0_7 = arith.constant 0 : index
    %8 = vector.load %arg6[%c0_6, %c0_7] : memref<8x128xf32, #tpu.memory_space<vmem>>, vector<8x128xf32>
    tpu.vector_store %arg6[%c0_6, %c0_7], %7 {strides = array<i32>} : memref<8x128xf32, #tpu.memory_space<vmem>>, vector<8x128xf32>,
    %c0_i32_8 = arith.constant 0 : i32
    %9 = arith.cmpi eq, %arg1, %c0_i32_8 : i32
    %10 = arith.extui %9 : i1 to i32
    %c0_i32_9 = arith.constant 0 : i32
    %11 = arith.cmpi ne, %10, %c0_i32_9 : i32
    scf.if %11 {
      %c0_10 = arith.constant 0 : index
      %c0_11 = arith.constant 0 : index
      %12 = vector.load %arg6[%c0_10, %c0_11] : memref<8x128xf32, #tpu.memory_space<vmem>>, vector<8x128xf32>
      %cst_12 = arith.constant dense<0.000000e+00> : vector<128xf32>
      %13 = vector.multi_reduction <add>, %12, %cst_12 [0] : vector<8x128xf32> to vector<128xf32>
      %14 = vector.shape_cast %13 : vector<128xf32> to vector<1x128xf32>
      %cst_13 = arith.constant 1.250000e-01 : f32
      %15 = vector.broadcast %cst_13 : f32 to vector<1x128xf32>
      %16 = arith.mulf %14, %15 : vector<1x128xf32>
      %17 = vector.broadcast %16 : vector<1x128xf32> to vector<8x128xf32>
      %18 = arith.subf %12, %17 : vector<8x128xf32>
      %19 = arith.mulf %18, %18 : vector<8x128xf32>
      %cst_14 = arith.constant dense<0.000000e+00> : vector<128xf32>
      %20 = vector.multi_reduction <add>, %19, %cst_14 [0] : vector<8x128xf32> to vector<128xf32>
      %21 = vector.shape_cast %20 : vector<128xf32> to vector<1x128xf32>
      %cst_15 = arith.constant 1.250000e-01 : f32
      %22 = vector.broadcast %cst_15 : f32 to vector<1x128xf32>
      %23 = arith.mulf %21, %22 : vector<1x128xf32>
      %c0_16 = arith.constant 0 : index
      %c0_17 = arith.constant 0 : index
      %24 = vector.load %arg4[%c0_16, %c0_17] : memref<2x128xf32, #tpu.memory_space<vmem>>, vector<1x128xf32>
      %cst_18 = arith.constant 9.99999974E-6 : f32
      %25 = vector.broadcast %cst_18 : f32 to vector<1x128xf32>
      %26 = arith.addf %23, %25 : vector<1x128xf32>
      %27 = math.rsqrt %26 : vector<1x128xf32>
      %28 = arith.mulf %24, %27 : vector<1x128xf32>
      %c1 = arith.constant 1 : index
      %c0_19 = arith.constant 0 : index
      %29 = vector.load %arg4[%c1, %c0_19] : memref<2x128xf32, #tpu.memory_space<vmem>>, vector<1x128xf32>
      %30 = vector.broadcast %28 : vector<1x128xf32> to vector<8x128xf32>
      %31 = arith.mulf %18, %30 : vector<8x128xf32>
      %32 = vector.broadcast %29 : vector<1x128xf32> to vector<8x128xf32>
      %33 = arith.addf %31, %32 : vector<8x128xf32>
      %cst_20 = arith.constant 0.000000e+00 : f32
      %34 = vector.broadcast %cst_20 : f32 to vector<8x128xf32>
      %35 = arith.maximumf %33, %34 : vector<8x128xf32>
      %c0_21 = arith.constant 0 : index
      %c0_22 = arith.constant 0 : index
      %36 = vector.load %arg5[%c0_21, %c0_22] : memref<8x128xf32, #tpu.memory_space<vmem>>, vector<8x128xf32>
      tpu.vector_store %arg5[%c0_21, %c0_22], %35 {strides = array<i32>} : memref<8x128xf32, #tpu.memory_space<vmem>>, vector<8x128xf32>,
    } else {
    }
    return
  }
  func.func @transform_0(%arg0: i32, %arg1: i32) -> (i32, i32) {
    %c0_i32 = arith.constant 0 : i32
    %c0_i32_0 = arith.constant 0 : i32
    return %c0_i32, %arg1 : i32, i32
  }
  func.func @transform_1(%arg0: i32, %arg1: i32) -> (i32, i32) {
    %c0_i32 = arith.constant 0 : i32
    return %arg1, %arg0 : i32, i32
  }
  func.func @transform_2(%arg0: i32, %arg1: i32) -> (i32, i32) {
    %c0_i32 = arith.constant 0 : i32
    %c0_i32_0 = arith.constant 0 : i32
    return %c0_i32, %arg0 : i32, i32
  }
  func.func @transform_3(%arg0: i32, %arg1: i32) -> (i32, i32) {
    %c0_i32 = arith.constant 0 : i32
    %c0_i32_0 = arith.constant 0 : i32
    return %c0_i32, %arg0 : i32, i32
  }
}

</mosaic_0001>

<bundles_post_ra>
// kernel: _dense_block_call.1
= control target key start
LH: loop header
LB: loop body
LE: loop exit
PB: predicated region body
PF: predicated region fallthrough
CT: control target
= control target key end

     0   :  { %8 = vsyncpa [#allocation4], 0  ;;  %s303_s0 = inlined_call_operand.hbm [shape: f32[8,32], index: 0, kind: input, shape index: {}]   ;;  %s304_s1 = inlined_call_operand.hbm [shape: f32[32,128], index: 1, kind: input, shape index: {}]   ;;  %s305_s2 = inlined_call_operand.hbm [shape: f32[2,128], index: 2, kind: input, shape index: {}]   ;;  %s306_s3 = inlined_call_operand.hbm [shape: f32[8,128], index: 3, kind: output, shape index: {}]  }
   0x1   :  { %9 = vsyncpa [#allocation7], 0  ;;  %s26_s14 = sshll.u32 %s304_s1, 4  ;;  %s27_s14 = int_to_ptr.hbm [resolvable:$true] %s26_s14 }
   0x2   :  { %10 = vsyncpa [#allocation5], 0  ;;  %s265_s15 = smov [#allocation6]   ;;  %s16_s19 = sshll.u32 %s303_s0, 4  ;;  %s17_s19 = int_to_ptr.hbm [resolvable:$true] %s16_s19 }
   0x3   :  { %s28_s16 = sshll.u32 %s265_s15, 4  ;;  %s266_s20 = smov 128   ;;  %s29_s16 = int_to_ptr.vmem [resolvable:$true] %s28_s16 }
   0x4   :  { %s267_s21 = smov 8   ;;  %s268_s22 = smov [#allocation3]  }
   0x5   :  { %34 = dma.hbm_to_vmem [thread:$0]  %s27_s14, 512, %s29_s16, [#allocation7], %s266_s20, %s266_s20, %s267_s21  }
   0x6   :  { %s18_s23 = sshll.u32 %s268_s22, 4  ;;  %s40_s26 = sshll.u32 %s305_s2, 4  ;;  %s19_s23 = int_to_ptr.vmem [resolvable:$true] %s18_s23  ;;  %s41_s26 = int_to_ptr.hbm [resolvable:$true] %s40_s26 }
   0x7   :  { %21 = dma.hbm_to_vmem [thread:$0]  %s17_s19, 128, %s19_s23, [#allocation4]  }
   0x8   :  { %s269_s1 = smov [#allocation8]  }
   0x9   :  { %s42_s27 = sshll.u32 %s269_s1, 4  ;;  %s43_s27 = int_to_ptr.vmem [resolvable:$true] %s42_s27 }
   0xa   :  { %45 = dma.hbm_to_vmem [thread:$0]  %s41_s26, 32, %s43_s27, [#allocation7]  }
   0xb   :  { %259 = dma.done.wait [#allocation4], 128  }
   0xc   :  { %260 = vsyncadd [#allocation4], 4294967168 }
   0xd   :  { %261 = dma.done.wait [#allocation7], 544  }
   0xe   :  { %262 = vsyncadd [#allocation7], 4294966752  ;;  %v68_v0 = vld [vmem:[#allocation6 + $0x18] sm:$0xff]  ;;  %v67_v1 = vld [vmem:[#allocation6 + $0x10] sm:$0xff]  ;;  %vm69_vm0 = vcmask 261120   ;;  %s270_s0 = smov [#allocation9]  }
   0xf   :  { %85 = vmatpush.msra.mxu0 %v68_v0  ;;  %v66_v2 = vld [vmem:[#allocation6 + $0x8] sm:$0xff]  ;;  %v65_v3 = vld [vmem:[#allocation6] sm:$0xff]  ;;  %v64_v4 = vld [vmem:[#allocation3] sm:$0xff]  ;;  %s140_s2 = sshll.u32 %s270_s0, 4  ;;  %s142_s30 = sshll.u32 %s306_s3, 4  ;;  %s141_s2 = int_to_ptr.vmem [resolvable:$true] %s140_s2  ;;  %s143_s30 = int_to_ptr.hbm [resolvable:$true] %s142_s30 }
  0x10   :  { %v115_v28 = vld [vmem:[#allocation8] sm:$0x1]  ;;  %v160_v33 = vld [vmem:[#allocation8 + $0x1] ss:$0 sm:$0xff] }
  0x11   :  { %86 = vmatpush.msra.mxu0 %v67_v1 }
  0x13   :  { %87 = vmatpush.msra.mxu0 %v66_v2 }
  0x15   :  { %88 = vmatpush.msra.mxu0 %v65_v3 }
  0x16   :  { %153 = vmatmul.msk.f32.vlgmr.msra.gmra.mxu0 %vm69_vm0, %v64_v4 }
  0x93   :  { %v90_v5 = vpop.f32.mrf.mxu0 }
  0x94   :  { %v99_v6 = vrot.slane %v90_v5, 4 }
  0x96   :  { %v100_v7 = vadd.f32 %v99_v6, %v90_v5 }
  0x98   :  { %v101_v8 = vrot.slane %v100_v7, 2 }
  0x9a   :  { %v102_v9 = vadd.f32 %v101_v8, %v100_v7 }
  0x9c   :  { %v103_v10 = vrot.slane %v102_v9, 1 }
  0x9e   :  { %v104_v11 = vadd.f32 %v103_v10, %v102_v9 }
  0xa0   :  { %v105_v12 = vmul.f32 0.125, %v104_v11 }
  0xa2   :  { %v106_v13 = vsub.f32 %v90_v5, %v105_v12 }
  0xa4   :  { %v107_v14 = vmul.f32 %v106_v13, %v106_v13 }
  0xa6   :  { %v108_v15 = vrot.slane %v107_v14, 4 }
  0xa8   :  { %v109_v16 = vadd.f32 %v108_v15, %v107_v14 }
  0xaa   :  { %v110_v17 = vrot.slane %v109_v16, 2 }
  0xac   :  { %v111_v18 = vadd.f32 %v110_v17, %v109_v16 }
  0xae   :  { %v112_v19 = vrot.slane %v111_v18, 1 }
  0xb0   :  { %v113_v20 = vadd.f32 %v112_v19, %v111_v18 }
  0xb2   :  { %v114_v21 = vmul.f32 0.125, %v113_v20 }
  0xb4   :  { %v116_v22 = vadd.f32 1e-05, %v114_v21 }
  0xb6   :  { %161 = vrsqrt.f32 %v116_v22  ;;  %vm123_vm2 = vweird.f32 %v116_v22 }
  0xbc   :  { %v162_v23 = vpop.eup %161 }
  0xbd   :  { %v118_v24 = vmul.f32 %v162_v23, %v116_v22  ;;  %vm124_vm1 = vweird.f32 %v162_v23 }
  0xbe   :  { %vm125_vm3 = vmor %vm123_vm2, %vm124_vm1 }
  0xbf   :  { %v119_v25 = vmul.f32 %v162_v23, %v118_v24 }
  0xc1   :  { %v120_v26 = vmul.f32 0.5, %v119_v25 }
  0xc3   :  { %v121_v27 = vsub.f32 1.5, %v120_v26 }
  0xc5   :  { %v122_v29 = vmul.f32 %v162_v23, %v121_v27 }
  0xc7   :  { %v126_v30 = vsel %vm125_vm3, %v162_v23, %v122_v29 }
  0xc8   :  { %v127_v31 = vmul.f32 %v126_v30, %v115_v28 }
  0xca   :  { %v129_v32 = vperm.slane %v127_v31, 0 }
  0xcc   :  { %v130_v34 = vmul.f32 %v129_v32, %v106_v13 }
  0xce   :  { %v132_v35 = vadd.f32 %v160_v33, %v130_v34 }
  0xd0   :  { %v133_v36 = vmax.f32 %v132_v35, 0.0 }
  0xd2   :  { %134 = vst [vmem:[#allocation9] sm:$0xff] %v133_v36 }
  0xd3   :  { %145 = dma.vmem_to_hbm [thread:$0]  %s141_s2, 128, %s143_s30, [#allocation5]  }
  0xd4   :  { %263 = dma.done.wait [#allocation5], 128  }
  0xd5   :  { %264 = vsyncadd [#allocation5], 4294967168 }
  0xd6   :  { %150 = vsyncpa [#allocation4], 1 }
  0xd7   :  { %151 = vsyncpa [#allocation7], 1 }
  0xd8   :  { %152 = vsyncpa [#allocation5], 1 }

</bundles_post_ra>
